<compile_context>
chip_gen: v6e
topology: v6e:2x2x1
jax: 0.10.0
libtpu: 0.0.40
codegen_flags: <defaults>
</compile_context>

<pallas_src>
import jax
import jax.numpy as jnp
from jax import lax
from jax.experimental import pallas as pl
from jax.experimental.pallas import tpu as pltpu

# ----------------------------- model sizes ----------------------------------
B = 2      # batch
S = 3      # number of sentences (recurrent steps)
T = 8      # max words per sentence
V = 50     # vocab size
D = 32     # eSize == hidden size
E = 8      # opt.ents (number of entities)
A = 4      # number of action operators


# ------------------------------ Pallas kernel -------------------------------
def npn_fused_kernel(ids_ref, pool_ref, emb_ref, posmask_ref, keys_ref,
                     w_proj_ref, b_proj_ref, w_bilin_ref, w_rec_ref,
                     ent_ref, joint_ref, acts_ref,
                     prev_attn_ref):
  """One NPN recurrent step; grid axis 0 = sentence index (sequential)."""
  s = pl.program_id(0)

  # ---- step 0: initialize entity state + recurrent attention ---------------
  @pl.when(s == 0)
  def _init():
    ent_ref[...] = jnp.broadcast_to(keys_ref[...][None], (B, E, D))
    prev_attn_ref[...] = jnp.zeros_like(prev_attn_ref)

  # ---- embedding lookup for BOTH encoders: one-hot x (V, 2D) on the MXU ----
  ids = ids_ref[0]                                                   # (B*T, 1)
  onehot = (ids == lax.broadcasted_iota(jnp.int32, (B * T, V), 1)
            ).astype(jnp.float32)                                    # (B*T, V)
  we = jnp.dot(onehot, emb_ref[...],
               preferred_element_type=jnp.float32) * posmask_ref[...]  # (B*T, 2D)

  # ---- SentenceEncoder x2: masked positional pooling as one matmul ---------
  pooled = jnp.dot(pool_ref[0], we,
                   preferred_element_type=jnp.float32)               # (B, 2D)

  # ---- fused projection: [sent@W_key | sent@W_nd | act@W_act + b_act] ------
  proj = jnp.dot(pooled, w_proj_ref[...],
                 preferred_element_type=jnp.float32) + b_proj_ref[...]
  h_wk = proj[:, :D]                                                 # (B, D)
  h_wn = proj[:, D:2 * D]                                            # (B, D)
  logits_a = proj[:, 2 * D:]                                         # (B, A)

  # ---- ActionSelector: softmax attention over action operators -------------
  m_a = jnp.max(logits_a, axis=-1, keepdims=True)
  e_a = jnp.exp(logits_a - m_a)
  w_a = e_a * pl.reciprocal(jnp.sum(e_a, axis=-1, keepdims=True), approx=True)

  # ---- EntitySelector: sigmoid recurrent attention over entity keys --------
  attn_acts = (jnp.einsum('bd,ed->be', h_wk, keys_ref[...],
                          preferred_element_type=jnp.float32)
               + w_rec_ref[0, 0] * prev_attn_ref[...])               # (B, E)
  attn = jax.nn.sigmoid(attn_acts)
  attn_norm = attn * pl.reciprocal(
      jnp.sum(attn, axis=-1, keepdims=True) + 1e-8, approx=True)
  entities = ent_ref[...]                                            # (B, E, D)
  selected = jnp.einsum('bqe,bed->bqd', attn_norm[:, None, :], entities,
                        preferred_element_type=jnp.float32)[:, 0, :]  # (B, D)

  # ---- BilinearApplicator: ReLU(sum_a w_a[:,a] * selected @ W_a) -----------
  # one lane-dense (D, A*D)=(32,128) MXU matmul instead of A tiny ones
  proj_all = jnp.dot(selected, w_bilin_ref[...],
                     preferred_element_type=jnp.float32)              # (B, A*D)
  changed = jnp.zeros((B, D), jnp.float32)
  for a in range(A):  # static unroll: lane-slice + broadcast FMA (VPU)
    changed = changed + w_a[:, a:a + 1] * proj_all[:, a * D:(a + 1) * D]
  changed = jnp.maximum(changed, 0.0)

  # ---- EntityUpdater: gated additive update + per-entity L2 renorm ---------
  ent_new = entities + attn[:, :, None] * changed[:, None, :]         # (B,E,D)
  inv_norm = lax.rsqrt(jnp.sum(ent_new * ent_new, axis=-1, keepdims=True) + 1e-8)
  ent_new = ent_new * inv_norm

  # ---- joint readout: n_dist = softmax(h_nd . keys); joint = sum_e n*ent ---
  nd_logits = jnp.einsum('bd,ed->be', h_wn, keys_ref[...],
                         preferred_element_type=jnp.float32)          # (B, E)
  m_n = jnp.max(nd_logits, axis=-1, keepdims=True)
  e_n = jnp.exp(nd_logits - m_n)
  n_dist = e_n * pl.reciprocal(jnp.sum(e_n, axis=-1, keepdims=True), approx=True)
  joint = jnp.einsum('bqe,bed->bqd', n_dist[:, None, :], ent_new,
                     preferred_element_type=jnp.float32)[:, 0, :]     # (B, D)

  # ---- write state / outputs ------------------------------------------------
  ent_ref[...] = ent_new          # resident across grid steps (constant block)
  joint_ref[...] = joint          # only the last step's value is written back
  acts_ref[0] = attn_acts         # per-step logits (for BCE selection loss)
  prev_attn_ref[...] = attn       # recurrent attention feedback


# ------------------------------ parameters ----------------------------------
def init_params(key):
  ks = jax.random.split(key, 10)
  return {
      "enc_emb": jax.random.normal(ks[0], (V, D), jnp.float32) * 0.1,
      "act_emb": jax.random.normal(ks[1], (V, D), jnp.float32) * 0.1,
      "enc_posmask": jax.random.normal(ks[2], (T, D), jnp.float32) * 0.1 + 1.0,
      "act_posmask": jax.random.normal(ks[3], (T, D), jnp.float32) * 0.1 + 1.0,
      "key_init": jax.random.normal(ks[4], (E, D), jnp.float32) * 0.1,
      "W_act": jax.random.normal(ks[5], (D, A), jnp.float32) * 0.1,
      "b_act": jnp.zeros((1, A), jnp.float32),
      "W_key": jax.random.normal(ks[6], (D, D), jnp.float32) * 0.1,
      "w_rec": jnp.full((1, 1), 0.5, jnp.float32),
      "W_bilin": jax.random.normal(ks[7], (A, D, D), jnp.float32) * 0.1,
      "W_nd": jax.random.normal(ks[8], (D, D), jnp.float32) * 0.1,
  }


def _pack_params(params):
  """Pack small weights into few lane-dense, kernel-resident tensors."""
  emb_both = jnp.concatenate([params["enc_emb"], params["act_emb"]], axis=-1)  # (V,2D)
  posmask_flat = jnp.tile(
      jnp.concatenate([params["enc_posmask"], params["act_posmask"]], axis=-1),
      (B, 1))                                                                   # (B*T,2D)
  # fused projection: rows 0:D act on sent_emb, rows D:2D on act_emb
  w_proj = jnp.zeros((2 * D, 2 * D + A), jnp.float32)
  w_proj = w_proj.at[:D, :D].set(params["W_key"])
  w_proj = w_proj.at[:D, D:2 * D].set(params["W_nd"])
  w_proj = w_proj.at[D:, 2 * D:].set(params["W_act"])
  b_proj = jnp.concatenate(
      [jnp.zeros((1, 2 * D), jnp.float32), params["b_act"]], axis=-1)           # (1,2D+A)
  # W_bilin (A, D, D) -> (D, A*D) so selected @ W gives all A projections at once
  w_bilin_flat = jnp.transpose(params["W_bilin"], (1, 0, 2)).reshape(D, A * D)
  return emb_both, posmask_flat, w_proj, b_proj, w_bilin_flat


# ------------------------------ NPN forward ---------------------------------
@jax.jit
def npn_forward(params, sentences, sentence_lengths):
  """sentences: (S, B, T) int32 word ids; sentence_lengths: (S, B) int32."""
  emb_both, posmask_flat, w_proj, b_proj, w_bilin_flat = _pack_params(params)

  ids_flat = sentences.reshape(S, B * T, 1).astype(jnp.int32)
  lmask = (jnp.arange(T)[None, None, :] < sentence_lengths[:, :, None]
           ).astype(jnp.float32)                                        # (S,B,T)
  # fold length mask into a block-diagonal pooling matrix: (S, B, B*T)
  pool_mat = (lmask[:, :, None, :] *
              jnp.eye(B, dtype=jnp.float32)[None, :, :, None]).reshape(S, B, B * T)

  entities, joint, _attn_acts = pl.pallas_call(
      npn_fused_kernel,
      grid_spec=pltpu.PrefetchScalarGridSpec(
          num_scalar_prefetch=0,
          grid=(S,),
          in_specs=[
              pl.BlockSpec((1, B * T, 1), lambda s: (s, 0, 0)),        # word ids
              pl.BlockSpec((1, B, B * T), lambda s: (s, 0, 0)),        # pooling matrix
              pl.BlockSpec((V, 2 * D), lambda s: (0, 0)),              # emb tables
              pl.BlockSpec((B * T, 2 * D), lambda s: (0, 0)),          # positional masks
              pl.BlockSpec((E, D), lambda s: (0, 0)),                  # entity keys
              pl.BlockSpec((2 * D, 2 * D + A), lambda s: (0, 0)),      # fused projection W
              pl.BlockSpec((1, 2 * D + A), lambda s: (0, 0)),          # fused projection b
              pl.BlockSpec((D, A * D), lambda s: (0, 0)),              # bilinear weights
              pl.BlockSpec(memory_space=pltpu.MemorySpace.SMEM),       # w_rec scalar
          ],
          out_specs=(
              pl.BlockSpec((B, E, D), lambda s: (0, 0, 0)),            # entities (resident)
              pl.BlockSpec((B, D), lambda s: (0, 0)),                  # joint (resident)
              pl.BlockSpec((1, B, E), lambda s: (s, 0, 0)),            # attn logits / step
          ),
          scratch_shapes=[pltpu.VMEM((B, E), jnp.float32)],            # recurrent attention
      ),
      out_shape=(
          jax.ShapeDtypeStruct((B, E, D), jnp.float32),
          jax.ShapeDtypeStruct((B, D), jnp.float32),
          jax.ShapeDtypeStruct((S, B, E), jnp.float32),
      ),
      compiler_params=pltpu.CompilerParams(
          dimension_semantics=("arbitrary",),          # sequential recurrence over S
          vmem_limit_bytes=16 * 1024 * 1024),
  )(ids_flat, pool_mat, emb_both, posmask_flat, params["key_init"],
    w_proj, b_proj, w_bilin_flat, params["w_rec"])

  # TODO(synk): sel_loss = sum_i BCEWithLogits(_attn_acts[i], entity_labels[i])
  # when entity_labels are provided; here entity_labels=None -> 0.
  sel_loss = jnp.float32(0.0)
  return entities, joint, sel_loss


# --------------------------------- main --------------------------------------
if __name__ == "__main__":
  key = jax.random.PRNGKey(0)
  k_par, k_sent, k_len = jax.random.split(key, 3)

  params = init_params(k_par)
  sentences = jax.random.randint(k_sent, (S, B, T), 0, V, dtype=jnp.int32)
  sentence_lengths = jax.random.randint(k_len, (S, B), 3, T + 1, dtype=jnp.int32)

  entities, joint, sel_loss = npn_forward(params, sentences, sentence_lengths)
  jax.block_until_ready((entities, joint, sel_loss))

  assert entities.shape == (B, E, D) and joint.shape == (B, D)
  assert bool(jnp.all(jnp.isfinite(entities))) and bool(jnp.all(jnp.isfinite(joint)))
  print("KERNEL_OK")
</pallas_src>

<mosaic_0001>
module attributes {stable_mosaic.version = 11 : i64} {
  func.func @npn_fused_kernel(%arg0: i32, %arg1: memref<1x16x1xi32, #tpu.memory_space<vmem>>, %arg2: memref<1x2x16xf32, #tpu.memory_space<vmem>>, %arg3: memref<50x64xf32, #tpu.memory_space<vmem>>, %arg4: memref<16x64xf32, #tpu.memory_space<vmem>>, %arg5: memref<8x32xf32, #tpu.memory_space<vmem>>, %arg6: memref<64x68xf32, #tpu.memory_space<vmem>>, %arg7: memref<1x68xf32, #tpu.memory_space<vmem>>, %arg8: memref<32x128xf32, #tpu.memory_space<vmem>>, %arg9: memref<1x1xf32, #tpu.memory_space<smem>>, %arg10: memref<2x8x32xf32, #tpu.memory_space<vmem>>, %arg11: memref<2x32xf32, #tpu.memory_space<vmem>>, %arg12: memref<1x2x8xf32, #tpu.memory_space<vmem>>, %arg13: memref<2x8xf32, #tpu.memory_space<vmem>>) attributes {dimension_semantics = [#tpu.dimension_semantics<arbitrary>], iteration_bounds = array<i64: 3>, scalar_prefetch = 0 : i64, scratch_operands = 1 : i64, tpu.core_type = #tpu.core_type<tc>, window_params = [{transform_indices = @transform_0, window_bounds = array<i64: 1, 16, 1>}, {transform_indices = @transform_1, window_bounds = array<i64: 1, 2, 16>}, {pipeline_mode = #tpu.pipeline_mode<synchronous>, transform_indices = @transform_2, window_bounds = array<i64: 50, 64>}, {pipeline_mode = #tpu.pipeline_mode<synchronous>, transform_indices = @transform_3, window_bounds = array<i64: 16, 64>}, {pipeline_mode = #tpu.pipeline_mode<synchronous>, transform_indices = @transform_4, window_bounds = array<i64: 8, 32>}, {pipeline_mode = #tpu.pipeline_mode<synchronous>, transform_indices = @transform_5, window_bounds = array<i64: 64, 68>}, {pipeline_mode = #tpu.pipeline_mode<synchronous>, transform_indices = @transform_6, window_bounds = array<i64: 1, 68>}, {pipeline_mode = #tpu.pipeline_mode<synchronous>, transform_indices = @transform_7, window_bounds = array<i64: 32, 128>}, {transform_indices = @transform_8, window_bounds = array<i64: 1, 1>}, {pipeline_mode = #tpu.pipeline_mode<synchronous>, transform_indices = @transform_9, window_bounds = array<i64: 2, 8, 32>}, {pipeline_mode = #tpu.pipeline_mode<synchronous>, transform_indices = @transform_10, window_bounds = array<i64: 2, 32>}, {transform_indices = @transform_11, window_bounds = array<i64: 1, 2, 8>}]} {
    %c0_i32 = arith.constant 0 : i32
    %0 = arith.cmpi eq, %arg0, %c0_i32 : i32
    %1 = arith.extui %0 : i1 to i32
    %c0_i32_0 = arith.constant 0 : i32
    %2 = arith.cmpi ne, %1, %c0_i32_0 : i32
    scf.if %2 {
      %c0_55 = arith.constant 0 : index
      %c0_56 = arith.constant 0 : index
      %118 = vector.load %arg5[%c0_55, %c0_56] : memref<8x32xf32, #tpu.memory_space<vmem>>, vector<8x32xf32>
      %119 = vector.shape_cast %118 : vector<8x32xf32> to vector<1x8x32xf32>
      %120 = vector.shape_cast %119 : vector<1x8x32xf32> to vector<1x8x32xf32>
      %121 = vector.broadcast %120 : vector<1x8x32xf32> to vector<2x8x32xf32>
      %c0_57 = arith.constant 0 : index
      %c0_58 = arith.constant 0 : index
      %c0_59 = arith.constant 0 : index
      %122 = vector.load %arg10[%c0_57, %c0_58, %c0_59] : memref<2x8x32xf32, #tpu.memory_space<vmem>>, vector<2x8x32xf32>
      tpu.vector_store %arg10[%c0_57, %c0_58, %c0_59], %121 {strides = array<i32>} : memref<2x8x32xf32, #tpu.memory_space<vmem>>, vector<2x8x32xf32>,
      %cst_60 = arith.constant 0.000000e+00 : f32
      %123 = vector.broadcast %cst_60 : f32 to vector<2x8xf32>
      %c0_61 = arith.constant 0 : index
      %c0_62 = arith.constant 0 : index
      %124 = vector.load %arg13[%c0_61, %c0_62] : memref<2x8xf32, #tpu.memory_space<vmem>>, vector<2x8xf32>
      tpu.vector_store %arg13[%c0_61, %c0_62], %123 {strides = array<i32>} : memref<2x8xf32, #tpu.memory_space<vmem>>, vector<2x8xf32>,
    } else {
    }
    %c0 = arith.constant 0 : index
    %c0_1 = arith.constant 0 : index
    %c0_2 = arith.constant 0 : index
    %3 = vector.load %arg1[%c0, %c0_1, %c0_2] : memref<1x16x1xi32, #tpu.memory_space<vmem>>, vector<1x16x1xi32>
    %4 = vector.shape_cast %3 : vector<1x16x1xi32> to vector<16x1xi32>
    %5 = tpu.iota {dimensions = array<i32: 1>} : vector<16x50xi32>
    %6 = vector.broadcast %4 : vector<16x1xi32> to vector<16x50xi32>
    %7 = arith.cmpi eq, %6, %5 : vector<16x50xi32>
    %8 = arith.extui %7 : vector<16x50xi1> to vector<16x50xi32>
    %9 = arith.sitofp %8 : vector<16x50xi32> to vector<16x50xf32>
    %c0_3 = arith.constant 0 : index
    %c0_4 = arith.constant 0 : index
    %10 = vector.load %arg3[%c0_3, %c0_4] : memref<50x64xf32, #tpu.memory_space<vmem>>, vector<50x64xf32>
    %cst = arith.constant dense<0.000000e+00> : vector<16x64xf32>
    %11 = tpu.matmul %9, %10, %cst {dimension_numbers = #tpu.dot_dimension_numbers<[1], [0], [0], [1], [0, 0, 1, 1], [], []>} : vector<16x50xf32>, vector<50x64xf32>, vector<16x64xf32> -> vector<16x64xf32>
    %c0_5 = arith.constant 0 : index
    %c0_6 = arith.constant 0 : index
    %12 = vector.load %arg4[%c0_5, %c0_6] : memref<16x64xf32, #tpu.memory_space<vmem>>, vector<16x64xf32>
    %13 = arith.mulf %11, %12 : vector<16x64xf32>
    %c0_7 = arith.constant 0 : index
    %c0_8 = arith.constant 0 : index
    %c0_9 = arith.constant 0 : index
    %14 = vector.load %arg2[%c0_7, %c0_8, %c0_9] : memref<1x2x16xf32, #tpu.memory_space<vmem>>, vector<1x2x16xf32>
    %15 = vector.shape_cast %14 : vector<1x2x16xf32> to vector<2x16xf32>
    %cst_10 = arith.constant dense<0.000000e+00> : vector<2x64xf32>
    %16 = tpu.matmul %15, %13, %cst_10 {dimension_numbers = #tpu.dot_dimension_numbers<[1], [0], [0], [1], [0, 0, 1, 1], [], []>} : vector<2x16xf32>, vector<16x64xf32>, vector<2x64xf32> -> vector<2x64xf32>
    %c0_11 = arith.constant 0 : index
    %c0_12 = arith.constant 0 : index
    %17 = vector.load %arg6[%c0_11, %c0_12] : memref<64x68xf32, #tpu.memory_space<vmem>>, vector<64x68xf32>
    %cst_13 = arith.constant dense<0.000000e+00> : vector<2x68xf32>
    %18 = tpu.matmul %16, %17, %cst_13 {dimension_numbers = #tpu.dot_dimension_numbers<[1], [0], [0], [1], [0, 0, 1, 1], [], []>} : vector<2x64xf32>, vector<64x68xf32>, vector<2x68xf32> -> vector<2x68xf32>
    %c0_14 = arith.constant 0 : index
    %c0_15 = arith.constant 0 : index
    %19 = vector.load %arg7[%c0_14, %c0_15] : memref<1x68xf32, #tpu.memory_space<vmem>>, vector<1x68xf32>
    %20 = vector.broadcast %19 : vector<1x68xf32> to vector<2x68xf32>
    %21 = arith.addf %18, %20 : vector<2x68xf32>
    %22 = vector.extract_strided_slice %21 {offsets = [0, 0], sizes = [2, 32], strides = [1, 1]} : vector<2x68xf32> to vector<2x32xf32>
    %23 = vector.extract_strided_slice %21 {offsets = [0, 32], sizes = [2, 32], strides = [1, 1]} : vector<2x68xf32> to vector<2x32xf32>
    %24 = vector.extract_strided_slice %21 {offsets = [0, 64], sizes = [2, 4], strides = [1, 1]} : vector<2x68xf32> to vector<2x4xf32>
    %cst_16 = arith.constant dense<0xFF800000> : vector<2xf32>
    %25 = vector.multi_reduction <maximumf>, %24, %cst_16 [1] : vector<2x4xf32> to vector<2xf32>
    %26 = vector.shape_cast %25 : vector<2xf32> to vector<2x1xf32>
    %27 = vector.broadcast %26 : vector<2x1xf32> to vector<2x4xf32>
    %28 = arith.subf %24, %27 : vector<2x4xf32>
    %29 = math.exp %28 : vector<2x4xf32>
    %cst_17 = arith.constant dense<0.000000e+00> : vector<2xf32>
    %30 = vector.multi_reduction <add>, %29, %cst_17 [1] : vector<2x4xf32> to vector<2xf32>
    %31 = vector.shape_cast %30 : vector<2xf32> to vector<2x1xf32>
    %32 = tpu.reciprocal %31 {approx = true} : vector<2x1xf32> -> vector<2x1xf32>
    %33 = vector.broadcast %32 : vector<2x1xf32> to vector<2x4xf32>
    %34 = arith.mulf %29, %33 : vector<2x4xf32>
    %c0_18 = arith.constant 0 : index
    %c0_19 = arith.constant 0 : index
    %35 = vector.load %arg5[%c0_18, %c0_19] : memref<8x32xf32, #tpu.memory_space<vmem>>, vector<8x32xf32>
    "tpu.trace_start"() <{level = 10 : i32, message = "bd,ed->be"}> : () -> ()
    %cst_20 = arith.constant dense<0.000000e+00> : vector<2x8xf32>
    %36 = tpu.matmul %22, %35, %cst_20 {dimension_numbers = #tpu.dot_dimension_numbers<[1], [1], [0], [0], [0, 0, 1, 0], [], []>} : vector<2x32xf32>, vector<8x32xf32>, vector<2x8xf32> -> vector<2x8xf32>
    "tpu.trace_stop"() : () -> ()
    %c0_21 = arith.constant 0 : index
    %c0_22 = arith.constant 0 : index
    %37 = memref.load %arg9[%c0_21, %c0_22] : memref<1x1xf32, #tpu.memory_space<smem>>
    %c0_23 = arith.constant 0 : index
    %c0_24 = arith.constant 0 : index
    %38 = vector.load %arg13[%c0_23, %c0_24] : memref<2x8xf32, #tpu.memory_space<vmem>>, vector<2x8xf32>
    %39 = vector.broadcast %37 : f32 to vector<2x8xf32>
    %40 = arith.mulf %39, %38 : vector<2x8xf32>
    %41 = arith.addf %36, %40 : vector<2x8xf32>
    %42 = arith.negf %41 : vector<2x8xf32>
    %43 = math.exp %42 : vector<2x8xf32>
    %cst_25 = arith.constant 1.000000e+00 : f32
    %44 = vector.broadcast %cst_25 : f32 to vector<2x8xf32>
    %45 = arith.addf %44, %43 : vector<2x8xf32>
    %46 = arith.divf %44, %45 : vector<2x8xf32>
    %cst_26 = arith.constant dense<0.000000e+00> : vector<2xf32>
    %47 = vector.multi_reduction <add>, %46, %cst_26 [1] : vector<2x8xf32> to vector<2xf32>
    %48 = vector.shape_cast %47 : vector<2xf32> to vector<2x1xf32>
    %cst_27 = arith.constant 9.99999993E-9 : f32
    %49 = vector.broadcast %cst_27 : f32 to vector<2x1xf32>
    %50 = arith.addf %48, %49 : vector<2x1xf32>
    %51 = tpu.reciprocal %50 {approx = true} : vector<2x1xf32> -> vector<2x1xf32>
    %52 = vector.broadcast %51 : vector<2x1xf32> to vector<2x8xf32>
    %53 = arith.mulf %46, %52 : vector<2x8xf32>
    %c0_28 = arith.constant 0 : index
    %c0_29 = arith.constant 0 : index
    %c0_30 = arith.constant 0 : index
    %54 = vector.load %arg10[%c0_28, %c0_29, %c0_30] : memref<2x8x32xf32, #tpu.memory_space<vmem>>, vector<2x8x32xf32>
    %55 = vector.shape_cast %53 : vector<2x8xf32> to vector<2x1x8xf32>
    "tpu.trace_start"() <{level = 10 : i32, message = "bqe,bed->bqd"}> : () -> ()
    %cst_31 = arith.constant dense<0.000000e+00> : vector<2x1x32xf32>
    %56 = tpu.matmul %55, %54, %cst_31 {dimension_numbers = #tpu.dot_dimension_numbers<[2], [1], [1], [2], [0, 0, 0, 1, 1, 2], [0], [0]>} : vector<2x1x8xf32>, vector<2x8x32xf32>, vector<2x1x32xf32> -> vector<2x1x32xf32>
    "tpu.trace_stop"() : () -> ()
    %57 = vector.shape_cast %56 : vector<2x1x32xf32> to vector<2x32xf32>
    %c0_32 = arith.constant 0 : index
    %c0_33 = arith.constant 0 : index
    %58 = vector.load %arg8[%c0_32, %c0_33] : memref<32x128xf32, #tpu.memory_space<vmem>>, vector<32x128xf32>
    %cst_34 = arith.constant dense<0.000000e+00> : vector<2x128xf32>
    %59 = tpu.matmul %57, %58, %cst_34 {dimension_numbers = #tpu.dot_dimension_numbers<[1], [0], [0], [1], [0, 0, 1, 1], [], []>} : vector<2x32xf32>, vector<32x128xf32>, vector<2x128xf32> -> vector<2x128xf32>
    %cst_35 = arith.constant 0.000000e+00 : f32
    %60 = vector.broadcast %cst_35 : f32 to vector<2x32xf32>
    %61 = vector.extract_strided_slice %34 {offsets = [0, 0], sizes = [2, 1], strides = [1, 1]} : vector<2x4xf32> to vector<2x1xf32>
    %62 = vector.extract_strided_slice %59 {offsets = [0, 0], sizes = [2, 32], strides = [1, 1]} : vector<2x128xf32> to vector<2x32xf32>
    %63 = vector.broadcast %61 : vector<2x1xf32> to vector<2x32xf32>
    %64 = arith.mulf %63, %62 : vector<2x32xf32>
    %65 = arith.addf %60, %64 : vector<2x32xf32>
    %66 = vector.extract_strided_slice %34 {offsets = [0, 1], sizes = [2, 1], strides = [1, 1]} : vector<2x4xf32> to vector<2x1xf32>
    %67 = vector.extract_strided_slice %59 {offsets = [0, 32], sizes = [2, 32], strides = [1, 1]} : vector<2x128xf32> to vector<2x32xf32>
    %68 = vector.broadcast %66 : vector<2x1xf32> to vector<2x32xf32>
    %69 = arith.mulf %68, %67 : vector<2x32xf32>
    %70 = arith.addf %65, %69 : vector<2x32xf32>
    %71 = vector.extract_strided_slice %34 {offsets = [0, 2], sizes = [2, 1], strides = [1, 1]} : vector<2x4xf32> to vector<2x1xf32>
    %72 = vector.extract_strided_slice %59 {offsets = [0, 64], sizes = [2, 32], strides = [1, 1]} : vector<2x128xf32> to vector<2x32xf32>
    %73 = vector.broadcast %71 : vector<2x1xf32> to vector<2x32xf32>
    %74 = arith.mulf %73, %72 : vector<2x32xf32>
    %75 = arith.addf %70, %74 : vector<2x32xf32>
    %76 = vector.extract_strided_slice %34 {offsets = [0, 3], sizes = [2, 1], strides = [1, 1]} : vector<2x4xf32> to vector<2x1xf32>
    %77 = vector.extract_strided_slice %59 {offsets = [0, 96], sizes = [2, 32], strides = [1, 1]} : vector<2x128xf32> to vector<2x32xf32>
    %78 = vector.broadcast %76 : vector<2x1xf32> to vector<2x32xf32>
    %79 = arith.mulf %78, %77 : vector<2x32xf32>
    %80 = arith.addf %75, %79 : vector<2x32xf32>
    %cst_36 = arith.constant 0.000000e+00 : f32
    %81 = vector.broadcast %cst_36 : f32 to vector<2x32xf32>
    %82 = arith.maximumf %80, %81 : vector<2x32xf32>
    %83 = vector.shape_cast %46 : vector<2x8xf32> to vector<2x8x1xf32>
    %84 = vector.shape_cast %82 : vector<2x32xf32> to vector<2x1x32xf32>
    %85 = vector.broadcast %83 : vector<2x8x1xf32> to vector<2x8x32xf32>
    %86 = vector.broadcast %84 : vector<2x1x32xf32> to vector<2x8x32xf32>
    %87 = arith.mulf %85, %86 : vector<2x8x32xf32>
    %88 = arith.addf %54, %87 : vector<2x8x32xf32>
    %89 = arith.mulf %88, %88 : vector<2x8x32xf32>
    %cst_37 = arith.constant dense<0.000000e+00> : vector<2x8xf32>
    %90 = vector.multi_reduction <add>, %89, %cst_37 [2] : vector<2x8x32xf32> to vector<2x8xf32>
    %91 = vector.shape_cast %90 : vector<2x8xf32> to vector<2x8x1xf32>
    %cst_38 = arith.constant 9.99999993E-9 : f32
    %92 = vector.broadcast %cst_38 : f32 to vector<2x8x1xf32>
    %93 = arith.addf %91, %92 : vector<2x8x1xf32>
    %94 = math.rsqrt %93 : vector<2x8x1xf32>
    %95 = vector.broadcast %94 : vector<2x8x1xf32> to vector<2x8x32xf32>
    %96 = arith.mulf %88, %95 : vector<2x8x32xf32>
    %c0_39 = arith.constant 0 : index
    %c0_40 = arith.constant 0 : index
    %97 = vector.load %arg5[%c0_39, %c0_40] : memref<8x32xf32, #tpu.memory_space<vmem>>, vector<8x32xf32>
    "tpu.trace_start"() <{level = 10 : i32, message = "bd,ed->be"}> : () -> ()
    %cst_41 = arith.constant dense<0.000000e+00> : vector<2x8xf32>
    %98 = tpu.matmul %23, %97, %cst_41 {dimension_numbers = #tpu.dot_dimension_numbers<[1], [1], [0], [0], [0, 0, 1, 0], [], []>} : vector<2x32xf32>, vector<8x32xf32>, vector<2x8xf32> -> vector<2x8xf32>
    "tpu.trace_stop"() : () -> ()
    %cst_42 = arith.constant dense<0xFF800000> : vector<2xf32>
    %99 = vector.multi_reduction <maximumf>, %98, %cst_42 [1] : vector<2x8xf32> to vector<2xf32>
    %100 = vector.shape_cast %99 : vector<2xf32> to vector<2x1xf32>
    %101 = vector.broadcast %100 : vector<2x1xf32> to vector<2x8xf32>
    %102 = arith.subf %98, %101 : vector<2x8xf32>
    %103 = math.exp %102 : vector<2x8xf32>
    %cst_43 = arith.constant dense<0.000000e+00> : vector<2xf32>
    %104 = vector.multi_reduction <add>, %103, %cst_43 [1] : vector<2x8xf32> to vector<2xf32>
    %105 = vector.shape_cast %104 : vector<2xf32> to vector<2x1xf32>
    %106 = tpu.reciprocal %105 {approx = true} : vector<2x1xf32> -> vector<2x1xf32>
    %107 = vector.broadcast %106 : vector<2x1xf32> to vector<2x8xf32>
    %108 = arith.mulf %103, %107 : vector<2x8xf32>
    %109 = vector.shape_cast %108 : vector<2x8xf32> to vector<2x1x8xf32>
    "tpu.trace_start"() <{level = 10 : i32, message = "bqe,bed->bqd"}> : () -> ()
    %cst_44 = arith.constant dense<0.000000e+00> : vector<2x1x32xf32>
    %110 = tpu.matmul %109, %96, %cst_44 {dimension_numbers = #tpu.dot_dimension_numbers<[2], [1], [1], [2], [0, 0, 0, 1, 1, 2], [0], [0]>} : vector<2x1x8xf32>, vector<2x8x32xf32>, vector<2x1x32xf32> -> vector<2x1x32xf32>
    "tpu.trace_stop"() : () -> ()
    %111 = vector.shape_cast %110 : vector<2x1x32xf32> to vector<2x32xf32>
    %c0_45 = arith.constant 0 : index
    %c0_46 = arith.constant 0 : index
    %c0_47 = arith.constant 0 : index
    %112 = vector.load %arg10[%c0_45, %c0_46, %c0_47] : memref<2x8x32xf32, #tpu.memory_space<vmem>>, vector<2x8x32xf32>
    tpu.vector_store %arg10[%c0_45, %c0_46, %c0_47], %96 {strides = array<i32>} : memref<2x8x32xf32, #tpu.memory_space<vmem>>, vector<2x8x32xf32>,
    %c0_48 = arith.constant 0 : index
    %c0_49 = arith.constant 0 : index
    %113 = vector.load %arg11[%c0_48, %c0_49] : memref<2x32xf32, #tpu.memory_space<vmem>>, vector<2x32xf32>
    tpu.vector_store %arg11[%c0_48, %c0_49], %111 {strides = array<i32>} : memref<2x32xf32, #tpu.memory_space<vmem>>, vector<2x32xf32>,
    %c0_50 = arith.constant 0 : index
    %c0_51 = arith.constant 0 : index
    %c0_52 = arith.constant 0 : index
    %114 = vector.load %arg12[%c0_50, %c0_51, %c0_52] : memref<1x2x8xf32, #tpu.memory_space<vmem>>, vector<1x2x8xf32>
    %115 = vector.shape_cast %114 : vector<1x2x8xf32> to vector<2x8xf32>
    %116 = vector.shape_cast %41 : vector<2x8xf32> to vector<1x2x8xf32>
    tpu.vector_store %arg12[%c0_50, %c0_51, %c0_52], %116 {strides = array<i32>} : memref<1x2x8xf32, #tpu.memory_space<vmem>>, vector<1x2x8xf32>,
    %c0_53 = arith.constant 0 : index
    %c0_54 = arith.constant 0 : index
    %117 = vector.load %arg13[%c0_53, %c0_54] : memref<2x8xf32, #tpu.memory_space<vmem>>, vector<2x8xf32>
    tpu.vector_store %arg13[%c0_53, %c0_54], %46 {strides = array<i32>} : memref<2x8xf32, #tpu.memory_space<vmem>>, vector<2x8xf32>,
    return
  }
  func.func @transform_0(%arg0: i32) -> (i32, i32, i32) {
    %c0_i32 = arith.constant 0 : i32
    %c0_i32_0 = arith.constant 0 : i32
    %c0_i32_1 = arith.constant 0 : i32
    return %arg0, %c0_i32, %c0_i32_0 : i32, i32, i32
  }
  func.func @transform_1(%arg0: i32) -> (i32, i32, i32) {
    %c0_i32 = arith.constant 0 : i32
    %c0_i32_0 = arith.constant 0 : i32
    %c0_i32_1 = arith.constant 0 : i32
    return %arg0, %c0_i32, %c0_i32_0 : i32, i32, i32
  }
  func.func @transform_2(%arg0: i32) -> (i32, i32) {
    %c0_i32 = arith.constant 0 : i32
    %c0_i32_0 = arith.constant 0 : i32
    %c0_i32_1 = arith.constant 0 : i32
    return %c0_i32, %c0_i32_0 : i32, i32
  }
  func.func @transform_3(%arg0: i32) -> (i32, i32) {
    %c0_i32 = arith.constant 0 : i32
    %c0_i32_0 = arith.constant 0 : i32
    %c0_i32_1 = arith.constant 0 : i32
    return %c0_i32, %c0_i32_0 : i32, i32
  }
  func.func @transform_4(%arg0: i32) -> (i32, i32) {
    %c0_i32 = arith.constant 0 : i32
    %c0_i32_0 = arith.constant 0 : i32
    %c0_i32_1 = arith.constant 0 : i32
    return %c0_i32, %c0_i32_0 : i32, i32
  }
  func.func @transform_5(%arg0: i32) -> (i32, i32) {
    %c0_i32 = arith.constant 0 : i32
    %c0_i32_0 = arith.constant 0 : i32
    %c0_i32_1 = arith.constant 0 : i32
    return %c0_i32, %c0_i32_0 : i32, i32
  }
  func.func @transform_6(%arg0: i32) -> (i32, i32) {
    %c0_i32 = arith.constant 0 : i32
    %c0_i32_0 = arith.constant 0 : i32
    %c0_i32_1 = arith.constant 0 : i32
    return %c0_i32, %c0_i32_0 : i32, i32
  }
  func.func @transform_7(%arg0: i32) -> (i32, i32) {
    %c0_i32 = arith.constant 0 : i32
    %c0_i32_0 = arith.constant 0 : i32
    %c0_i32_1 = arith.constant 0 : i32
    return %c0_i32, %c0_i32_0 : i32, i32
  }
  func.func @transform_8(%arg0: i32) -> (i32, i32) {
    %c0_i32 = arith.constant 0 : i32
    %c0_i32_0 = arith.constant 0 : i32
    %c0_i32_1 = arith.constant 0 : i32
    return %c0_i32, %c0_i32_0 : i32, i32
  }
  func.func @transform_9(%arg0: i32) -> (i32, i32, i32) {
    %c0_i32 = arith.constant 0 : i32
    %c0_i32_0 = arith.constant 0 : i32
    %c0_i32_1 = arith.constant 0 : i32
    %c0_i32_2 = arith.constant 0 : i32
    return %c0_i32, %c0_i32_0, %c0_i32_1 : i32, i32, i32
  }
  func.func @transform_10(%arg0: i32) -> (i32, i32) {
    %c0_i32 = arith.constant 0 : i32
    %c0_i32_0 = arith.constant 0 : i32
    %c0_i32_1 = arith.constant 0 : i32
    return %c0_i32, %c0_i32_0 : i32, i32
  }
  func.func @transform_11(%arg0: i32) -> (i32, i32, i32) {
    %c0_i32 = arith.constant 0 : i32
    %c0_i32_0 = arith.constant 0 : i32
    %c0_i32_1 = arith.constant 0 : i32
    return %arg0, %c0_i32, %c0_i32_0 : i32, i32, i32
  }
}

</mosaic_0001>

<bundles_post_ra>
// kernel: npn_forward.1
= control target key start
LH: loop header
LB: loop body
LE: loop exit
PB: predicated region body
PF: predicated region fallthrough
CT: control target
= control target key end

     0   :  { %s2293_s0 = inlined_call_operand.vmem [shape: s32[3,16,1], index: 0, kind: input, shape index: {}]   ;;  %s2294_s1 = inlined_call_operand.vmem [shape: f32[3,2,16], index: 1, kind: input, shape index: {}]   ;;  %s2295_s2 = inlined_call_operand.vmem [shape: f32[50,64], index: 2, kind: input, shape index: {}]   ;;  %s2296_s3 = inlined_call_operand.vmem [shape: f32[16,64], index: 3, kind: input, shape index: {}]   ;;  %s2297_s4 = inlined_call_operand.vmem [shape: f32[8,32], index: 4, kind: input, shape index: {}]   ;;  %s2298_s5 = inlined_call_operand.vmem [shape: f32[64,68], index: 5, kind: input, shape index: {}]   ;;  %s2299_s6 = inlined_call_operand.vmem [shape: f32[1,68], index: 6, kind: input, shape index: {}]   ;;  %s2300_s7 = inlined_call_operand.vmem [shape: f32[32,128], index: 7, kind: input, shape index: {}]   ;;  %s2301_s8 = inlined_call_operand.<no memory space> [shape: f32[1,1], index: 8, kind: input, shape index: {}]   ;;  %s2302_s9 = inlined_call_operand.hbm [shape: f32[2,8,32], index: 9, kind: output, shape index: {0}]   ;;  %s2303_s10 = inlined_call_operand.hbm [shape: f32[2,32], index: 10, kind: output, shape index: {1}]   ;;  %s2304_s11 = inlined_call_operand.hbm [shape: f32[3,2,8], index: 11, kind: output, shape index: {2}]  }
   0x1   :  { %2307 = sst [smem:[#allocation13_spill]] %s2293_s0 }
   0x2   :  { %2308 = sst [smem:[#allocation14_spill]] %s2294_s1 }
   0x3   :  { %2309 = sst [smem:[#allocation15_spill]] %s2295_s2 }
   0x4   :  { %2310 = sst [smem:[#allocation16_spill]] %s2296_s3 }
   0x5   :  { %17 = sst [smem:[#allocation3]] %s2301_s8 }
   0x6   :  { %18 = vsyncpa [#allocation5], 0 }
   0x7   :  { %19 = vsyncpa [#allocation7], 0  ;;  %s1994_s19 = smov 0   ;;  %s1996_s20 = smov 0  }
   0x8   :  { %s1998_s21 = smov 0   ;;  %s2000_s22 = smov 0  }
   0x9 LB: > { %s2013_s8 = sadd.s32 4294967295, %s1912_s22   ;;  %s2305_s23 = sadd.s32 4294967294, %s1912_s22   ;;  %s1912_s22 = sphi %s2000_s22, %s2329_s22   ;;  %s1908_s21 = sphi %s1998_s21, %s2328_s21   ;;  %s1904_s20 = sphi %s1996_s20, %s2327_s20   ;;  %s1900_s19 = sphi %s1994_s19, %s2326_s19  }
   0xa   : > { %s2017_s24 = sadd.s32 1, %s1912_s22   ;;  %s273_s25 = sadd.s32 1, %s1908_s21 }
   0xb   : > { %s270_s26 = ssub.s32 %s1912_s22, %s2017_s24  ;;  %p283_p0 = scmp.ne.s32.totalorder %s1908_s21, %s1904_s20 }
   0xc   : > { %p271_p1 = scmp.eq.s32.totalorder %s270_s26, 0  ;;  %p2306_p2 = scmp.eq.s32.totalorder %s2013_s8, 2 }
   0xd   : > { %p289_p3 = scmp.ne.s32.totalorder %s1904_s20, %s1900_s19  ;;  %p290_p4 = scmp.eq.s32.totalorder %s2305_s23, 2 }
   0xe   : > { %s2029_s27 = scalar_select %p271_p1, %s1908_s21, %s273_s25  }
   0xf   : > { %p2033_p5 = por %p2306_p2, %p283_p0  ;;  %p2037_p6 = por %p290_p4, %p289_p3 }
  0x10   : > { %2311 = sst [smem:[#allocation12_spill]] %s2029_s27  ;;  %p1550_p7 = scmp.ge.s32.totalorder %s1912_s22, 1 }
  0x11   : > { %p344_p8 = scmp.lt.s32.totalorder %s1912_s22, 4 }
  0x13   : > { %p345_p9 = pnand %p1550_p7, %p344_p8 }
  0x14   : > { %s385_s30 = sand.u32 (!%p345_p9), 1, %s1904_s20   ;;  %p388_p10 = scmp.lt.s32.totalorder (!%p345_p9), %s2013_s8, 2 }
  0x15   : > { %348 = sbr.rel (%p345_p9) target bundleno = 2046 (0x7fe), region = 56  ;;  %s2045_s12 = sshll.u32 (!%p345_p9), %s385_s30, 1 }
  0x16   : > { %s2314_s0 = sld [smem:[#allocation13_spill]] (!%p345_p9)  ;;  %s387_s23 = scalar_lea.vmem (!%p345_p9), [#allocation8], %s2045_s12 }
  0x17   : > { %s2315_s1 = sld [smem:[#allocation14_spill]] (!%p345_p9)  ;;  %p1555_p11 = scmp.ne.s32.totalorder (!%p345_p9), %s2013_s8, 0 }
  0x1a   : > { %s389_s13 = scalar_select %p388_p10, %s2013_s8, 2 }
  0x1b   : > { %400 = sbr.rel (%p1555_p11) target bundleno = 35 (0x23), region = 60 }
  0x1c   : > { %s1582_s14 = sshll.u32 %s389_s13, 4  ;;  %s1554_s15 = sshll.u32 %s389_s13, 1 }
  0x1d   : > { %s392_s18 = scalar_lea.vmem %s2314_s0, %s1582_s14  ;;  %s2054_s26 = scalar_lea.vmem %s2315_s1, %s1554_s15 }
  0x20   : > { %v401_v0 = vld [vmem:[%s2297_s4] sm:$0xff]  ;;  %vm402_vm0 = vcmask 261120   ;;  %vm405_vm1 = vcmask 58368   ;;  %v1914_v1 = vmov 0.0  }
  0x21   : > { %403 = vst.msk [vmem:[#allocation4] sm:$0xff] %vm402_vm0, %v401_v0  ;;  %404 = vst.msk [vmem:[#allocation4 + $0x8] sm:$0xff] %vm402_vm0, %v401_v0 }
  0x22   : > { %406 = vst.msk [vmem:[#allocation2] sm:$0x3] %vm405_vm1, %v1914_v1 }
  0x23 PF: > { %v407_v2 = vld [vmem:[%s392_s18] sm:$0xff]  ;;  %s2316_s2 = sld [smem:[#allocation15_spill]]  ;;  %vm437_vm2 = vcmask 1041408   ;;  %v1915_v4 = vmov 0   ;;  %v408_v7 = vld [vmem:[%s392_s18 + $0x8] sm:$0xff]  ;;  %v1916_v8 = vmov 0.0   ;;  %v409_v13 = vlaneseq }
  0x24   : > { %1772 = vset.pattern.permute.xlu0 %v1915_v4  ;;  %1638 = vmatprep.subr.mxu1 %v1916_v8  ;;  %vm430_vm3 = vcmask 408576   ;;  %vm1917_vm6 = vmmov 0   ;;  %s2317_s3 = sld [smem:[#allocation16_spill]]  ;;  %v520_v25 = vld [vmem:[%s2054_s26] sm:$0x3]  ;;  %vm521_vm7 = vcmask 130048  }
  0x25   : > { %412 = vperm.xlu0 %1772, %v407_v2   ;;  %v410_v14 = vand.u32 127, %v409_v13  ;;  %1642 = vmatprep.mubr.msk.f32.mxu1 %vm1917_vm6, %v1916_v8  ;;  %v602_v26 = vld [vmem:[%s2298_s5 + $0x38] sm:$0xff]  ;;  %v601_v27 = vld [vmem:[%s2298_s5 + $0x30] sm:$0xff]  ;;  %v600_v28 = vld [vmem:[%s2298_s5 + $0x28] sm:$0xff]  ;;  %vm610_vm8 = vcmask 523264   ;;  %vm706_vm9 = vcmask 261120  }
  0x26   : > { %v599_v29 = vld [vmem:[%s2298_s5 + $0x20] sm:$0xff]  ;;  %v598_v30 = vld [vmem:[%s2298_s5 + $0x18] sm:$0xff]  ;;  %v597_v31 = vld [vmem:[%s2298_s5 + $0x10] sm:$0xff]  ;;  %s1918_s19 = smov 96   ;;  %s702_s25 = sld [smem:[#allocation3]]  ;;  %vm789_vm10 = vcmask 58368  }
  0x27   : > { %v596_v32 = vld [vmem:[%s2298_s5 + $0x8] sm:$0xff]  ;;  %v595_v33 = vld [vmem:[%s2298_s5] sm:$0xff]  ;;  %vm684_vm11 = vcmask 550400   ;;  %v1919_v59 = vmov 1966171168   ;;  %v2169_v63 = vshrl.u32 %v409_v13, 7 }
  0x28   : > { %v2139_v36 = vld [vmem:[%s2297_s4] sm:$0xff]  ;;  %v2164_v54 = vld [vmem:[#allocation4 + $0x8] sm:$0xff]  ;;  %v800_v60 = vunpack.c.l.s4 %v1919_v59  ;;  %vm821_vm12 = vcmask 64512   ;;  %s1920_s14 = smov 64   ;;  %vm695_vm13 = vcmask 25600   ;;  %vm973_vm14 = vcmask 1041409  }
  0x29   : > { %v429_v3 = vld [vmem:[%s2316_s2 + $0x30] sm:$0x3]  ;;  %v428_v5 = vld [vmem:[%s2316_s2 + $0x28] sm:$0xff]  ;;  %v427_v6 = vld [vmem:[%s2316_s2 + $0x20] sm:$0xff]  ;;  %415 = vperm.xlu0 %1772, %v408_v7  }
  0x2a   : > { %1621 = vmatprep.subr.msk.mxu0 %vm437_vm2, %v429_v3  ;;  %v426_v9 = vld [vmem:[%s2316_s2 + $0x18] sm:$0xff]  ;;  %v425_v10 = vld [vmem:[%s2316_s2 + $0x10] sm:$0xff]  ;;  %v424_v11 = vld [vmem:[%s2316_s2 + $0x8] sm:$0xff]  ;;  %v801_v62 = vunpack.c.0.s8 %v800_v60 }
  0x2b   : > { %1622 = vmatpush3.msk.msra.mxu0 %vm437_vm2, %v429_v3  ;;  %v423_v12 = vld [vmem:[%s2316_s2] sm:$0xff]  ;;  %v517_v19 = vld [vmem:[%s2317_s3 + $0x8] sm:$0xff] }
  0x2c   : > { %1623 = vmatprep.subr.mxu0 %v428_v5  ;;  %v516_v21 = vld [vmem:[%s2317_s3] sm:$0xff]  ;;  %v704_v42 = vstv %s702_s25  ;;  %v2172_v0 = vsub.s32 %v801_v62, %v2169_v63  ;;  %s1925_s25 = smov 32  }
  0x2d   : > { %1624 = vmatpush3.msra.mxu0 %v428_v5  ;;  %v1562_v37 = vld [vmem:[%s2299_s6] ss:$0 sm:$0xff]  ;;  %v2160_v53 = vld [vmem:[#allocation4] sm:$0xff] }
  0x2e   : > { %1625 = vmatprep.subr.mxu0 %v427_v6  ;;  %v703_v41 = vld [vmem:[#allocation2] sm:$0x3] }
  0x2f   : > { %1626 = vmatpush3.msra.mxu0 %v427_v6  ;;  %v705_v43 = vmul.f32 %v704_v42, %v703_v41  ;;  %v969_v6 = vld [vmem:[%s2300_s7 + $0x18] sm:$0xff]  ;;  %v966_v13 = vld [vmem:[%s2300_s7] sm:$0xff]  ;;  %v1087_v41 = vsub.s32 0, %v2169_v63 }
  0x30   : > { %1627 = vmatprep.subr.mxu0 %v426_v9 }
  0x31   : > { %1628 = vmatpush3.msra.mxu0 %v426_v9 }
  0x32   : > { %1629 = vmatprep.subr.mxu0 %v425_v10 }
  0x33   : > { %1630 = vmatpush3.msra.mxu0 %v425_v10 }
  0x34   : > { %1631 = vmatprep.subr.mxu0 %v424_v11 }
  0x35   : > { %1632 = vmatpush3.msra.mxu0 %v424_v11  ;;  %v968_v11 = vld [vmem:[%s2300_s7 + $0x10] sm:$0xff] }
  0x36   : > { %1633 = vmatprep.subr.mxu0 %v423_v12 }
  0x37   : > { %1634 = vmatpush3.msra.mxu0 %v423_v12  ;;  %v967_v12 = vld [vmem:[%s2300_s7 + $0x8] sm:$0xff] }
  0x38   : > { %1664 = vmatprep.subr.mxu0 %v1916_v8 }
  0xa0   : > { %v413_v15 = vpop.permute.xlu0 %412 }
  0xa1   : > { %vm417_vm4 = vcmp.eq.s32.totalorder %v413_v15, %v410_v14 }
  0xa2   : > { %v1556_v16 = vsel %vm417_vm4, 1.0, %v1916_v8 }
  0xa3   : > { %1635 = vmatprep.mubr.msk.f32.mxu0 %vm430_vm3, %v1556_v16  ;;  %v1921_v16 = vmov 65  }
  0xa4   : > { %v416_v17 = vpop.permute.xlu0 %415  ;;  %1773 = vset.pattern.permute.xlu1 %v1921_v16 }
  0xa5   : > { %vm418_vm5 = vcmp.eq.s32.totalorder %v416_v17, %v410_v14  ;;  %v1922_v17 = vmov 64  }
  0xa6   : > { %v1557_v18 = vsel %vm418_vm5, 1.0, %v1916_v8  ;;  %1776 = vset.pattern.permute.xlu0 %v1922_v17 }
  0xa7   : > { %1636 = vmatmul.mubr.msk.f32.vlgmr.msra.gmra.mxu0 %vm430_vm3, %v1557_v18 }
  0xa8   : > { %1666 = vmatprep.mubr.msk.f32.mxu0 %vm1917_vm6, %v1916_v8  ;;  %1665 = vmatpush3.xpose.msk.msra.mxu0 %vm706_vm9, %v2139_v36 }
  0xa9   : > { %1669 = vmatprep.subr.mxu0 %v1916_v8 }
 0x167   : > { %v1637_v20 = vpop.f32.mrf.mxu0 }
 0x168   : > { %v519_v22 = vmul.f32 %v1637_v20, %v517_v19 }
 0x169   : > { %v507_v23 = vpop.f32.mrf.mxu0 }
 0x16a   : > { %v518_v24 = vmul.f32 %v516_v21, %v507_v23  ;;  %1639 = vmatpush3.msra.mxu1 %v519_v22 }
 0x16b   : > { %1640 = vmatprep.subr.mxu1 %v1916_v8 }
 0x16c   : > { %1641 = vmatpush3.msra.mxu1 %v518_v24 }
 0x16d   : > { %1643 = vmatmul.mubr.msk.f32.vlgmr.msra.gmra.mxu1 %vm521_vm7, %v520_v25  ;;  %1645 = vmatprep.subr.mxu1 %v1916_v8 }
 0x16e   : > { %1646 = vmatpush3.msra.mxu1 %v602_v26  ;;  %1661 = vmatprep.mubr.msk.f32.mxu1 %vm1917_vm6, %v1916_v8 }
 0x16f   : > { %1647 = vmatprep.subr.mxu1 %v1916_v8 }
 0x170   : > { %1648 = vmatpush3.msra.mxu1 %v601_v27 }
 0x171   : > { %1649 = vmatprep.subr.mxu1 %v1916_v8 }
 0x172   : > { %1650 = vmatpush3.msra.mxu1 %v600_v28 }
 0x173   : > { %1651 = vmatprep.subr.mxu1 %v1916_v8 }
 0x174   : > { %1652 = vmatpush3.msra.mxu1 %v599_v29  ;;  %v1923_v29 = vmov 66  }
 0x175   : > { %1653 = vmatprep.subr.mxu1 %v1916_v8 }
 0x176   : > { %1654 = vmatpush3.msra.mxu1 %v598_v30  ;;  %v1924_v30 = vmov 67  }
 0x177   : > { %1655 = vmatprep.subr.mxu1 %v1916_v8 }
 0x178   : > { %1656 = vmatpush3.msra.mxu1 %v597_v31 }
 0x179   : > { %1657 = vmatprep.subr.mxu1 %v1916_v8 }
 0x17a   : > { %1658 = vmatpush3.msra.mxu1 %v596_v32 }
 0x17b   : > { %1659 = vmatprep.subr.mxu1 %v1916_v8 }
 0x17c   : > { %1660 = vmatpush3.msra.mxu1 %v595_v33 }
 0x17d   : > { %1674 = vmatprep.subr.mxu1 %v1916_v8 }
 0x22d   : > { %v591_v34 = vpop.f32.mrf.mxu1 }
 0x22e   : > { %1662 = vmatmul.mubr.msk.f32.vlgmr.msra.gmra.mxu1 %vm610_vm8, %v591_v34 }
 0x22f   : > { %v1644_v35 = vpop.f32.mrf.mxu1  ;;  %1676 = vmatprep.mubr.msk.f32.mxu1 %vm1917_vm6, %v1916_v8  ;;  %1675 = vmatpush3.msra.mxu1 %v2164_v54 }
 0x230   : > { %1690 = vmatprep.subr.mxu1 %v1916_v8 }
 0x2ee   : > { %v680_v38 = vpop.f32.mrf.mxu1 }
 0x2ef   : > { %v681_v39 = vadd.f32 %v1562_v37, %v680_v38  ;;  %v1094_v37 = vsub.s32 1, %v2169_v63 }
 0x2f0   : > { %v1663_v40 = vpop.f32.mrf.mxu1 }
 0x2f1   : > { %1151 = vrot.lane.b32.xlu0 %v681_v39, %s1918_s19  ;;  %1667 = vmatmul.mubr.msk.f32.vlgmr.msra.gmra.mxu0 %vm706_vm9, %v681_v39  ;;  %v685_v52 = vsel %vm684_vm11, %v681_v39, -inf }
 0x2f2   : > { %1671 = vmatprep.mubr.msk.f32.mxu0 %vm1917_vm6, %v1916_v8  ;;  %1670 = vmatpush3.msra.mxu0 %v2160_v53 }
 0x2f3   : > { %1679 = vmatprep.subr.mxu0 %v1916_v8 }
 0x363   : > { %v1152_v10 = vpop.permute.xlu0 %1151 }
 0x3b1   : > { %v779_v44 = vpop.f32.mrf.mxu0 }
 0x3b2   : > { %v780_v45 = vadd.f32 %v779_v44, %v705_v43 }
 0x3b3   : > { %v1668_v46 = vpop.f32.mrf.mxu0 }
 0x3b4   : > { %v1566_v47 = vmul.f32 -1.442695, %v780_v45  ;;  %1415 = vst.msk [vmem:[%s387_s23] sm:$0x3] %vm789_vm10, %v780_v45 }
 0x3b6   : > { %1778 = vpow2.f32 %v1566_v47 }
 0x3c3   : > { %v1779_v48 = vpop.eup %1778 }
 0x3c4   : > { %v786_v49 = vadd.f32 1.0, %v1779_v48 }
 0x3c6   : > { %1780 = vrcp.f32 %v786_v49 }
 0x3d3   : > { %v2154_v50 = vpop.eup %1780 }
 0x3d4   : > { %1416 = vst.msk [vmem:[#allocation2] sm:$0x3] %vm789_vm10, %v2154_v50  ;;  %v790_v51 = vsel %vm789_vm10, %v2154_v50, 0.0  ;;  %v1088_v42 = vrot.slane %v2154_v50, %v1087_v41 }
 0x3d5   : > { %791 = vadd.xlane.f32.xlu1 %v790_v51 }
 0x3d9   : > { %686 = vmax.xlane.f32.xlu1 %v685_v52 }
 0x45e   : > { %v792_v55 = vpop.xlane.xlu1 %791 }
 0x45f   : > { %v793_v56 = vadd.f32 1e-08, %v792_v55 }
 0x461   : > { %1782 = vrcp.f32 %v793_v56 }
 0x462   : > { %v687_v57 = vpop.xlane.xlu1 %686 }
 0x463   : > { %v688_v58 = vsub.f32 %v681_v39, %v687_v57  ;;  %v1095_v39 = vrot.slane %v2154_v50, %v1094_v37 }
 0x465   : > { %v689_v61 = vmul.f32 1.442695, %v688_v58 }
 0x467   : > { %1784 = vpow2.f32 %v689_v61 }
 0x46e   : > { %v1783_v1 = vpop.eup %1782 }
 0x46f   : > { %v795_v2 = vmul.f32 %v1783_v1, %v2154_v50 }
 0x471   : > { %v805_v3 = vrot.slane %v795_v2, %v2172_v0 }
 0x473   : > { %v813_v4 = vrot.slane %v805_v3, %v2172_v0  ;;  %v806_v5 = vcombine.high %v805_v3, %v805_v3 }
 0x474   : > { %v1785_v7 = vpop.eup %1784 }
 0x475   : > { %1672 = vmatmul.mubr.msk.f32.vlgmr.msra.gmra.mxu0 %vm821_vm12, %v813_v4  ;;  %692 = vrot.lane.b32.xlu1 %v1785_v7, %s1920_s14  ;;  %v820_v9 = vrot.slane %v806_v5, %v2172_v0 }
 0x476   : > { %1680 = vmatpush3.msra.mxu0 %v969_v6  ;;  %1687 = vmatprep.mubr.msk.f32.mxu0 %vm1917_vm6, %v1916_v8 }
 0x477   : > { %1677 = vmatmul.mubr.msk.f32.vlgmr.msra.gmra.mxu1 %vm821_vm12, %v820_v9  ;;  %1681 = vmatprep.subr.mxu0 %v1916_v8 }
 0x478   : > { %1691 = vmatpush3.xpose.msk.msra.mxu1 %vm706_vm9, %v2139_v36  ;;  %1692 = vmatprep.mubr.msk.f32.mxu1 %vm1917_vm6, %v1916_v8 }
 0x479   : > { %1695 = vmatprep.subr.mxu1 %v1916_v8  ;;  %1682 = vmatpush3.msra.mxu0 %v968_v11 }
 0x47a   : > { %1683 = vmatprep.subr.mxu0 %v1916_v8 }
 0x47b   : > { %1693 = vmatmul.mubr.msk.f32.vlgmr.msra.gmra.mxu1 %vm706_vm9, %v1152_v10  ;;  %1684 = vmatpush3.msra.mxu0 %v967_v12 }
 0x47c   : > { %1697 = vmatprep.mubr.msk.f32.mxu1 %vm1917_vm6, %v1916_v8  ;;  %1685 = vmatprep.subr.mxu0 %v1916_v8 }
 0x47d   : > { %1686 = vmatpush3.msra.mxu0 %v966_v13 }
 0x47e   : > { %1700 = vmatprep.subr.mxu0 %v1916_v8 }
 0x4e7   : > { %v693_v14 = vpop.permute.xlu1 %692 }
 0x4e8   : > { %v696_v15 = vsel %vm695_vm13, %v693_v14, 0.0 }
 0x4e9   : > { %697 = vadd.xlane.f32.xlu0 %v696_v15 }
 0x535   : > { %v890_v18 = vpop.f32.mrf.mxu0 }
 0x537   : > { %v1673_v19 = vpop.f32.mrf.mxu0  ;;  %v962_v20 = vpop.f32.mrf.mxu1 }
 0x538   : > { %v972_v21 = vrot.slane %v962_v20, 7 }
 0x539   : > { %v1678_v22 = vpop.f32.mrf.mxu1 }
 0x53a   : > { %v974_v23 = vsel %vm973_vm14, %v972_v21, %v890_v18 }
 0x53b   : > { %1688 = vmatmul.mubr.msk.f32.vlgmr.msra.gmra.mxu0 %vm706_vm9, %v974_v23  ;;  %v1224_v24 = vpop.f32.mrf.mxu1 }
 0x53c   : > { %1702 = vmatprep.mubr.msk.f32.mxu0 %vm1917_vm6, %v1916_v8  ;;  %v1228_v31 = vsel %vm789_vm10, %v1224_v24, -inf }
 0x53d   : > { %v1694_v25 = vpop.f32.mrf.mxu1 }
 0x572   : > { %v698_v26 = vpop.xlane.xlu0 %697 }
 0x573   : > { %1786 = vrcp.f32 %v698_v26 }
 0x580   : > { %v1787_v27 = vpop.eup %1786 }
 0x581   : > { %v700_v28 = vmul.f32 %v1787_v27, %v1785_v7 }
 0x583   : > { %1049 = vperm.xlu0 %1776, %v700_v28   ;;  %1055 = vperm.xlu1 %1773, %v700_v28  }
 0x587   : > { %1774 = vset.pattern.permute.xlu1 %v1923_v29  ;;  %1777 = vset.pattern.permute.xlu0 %v1924_v30 }
 0x588   : > { %1065 = vperm.xlu1 %1774, %v700_v28  }
 0x58c   : > { %1775 = vset.pattern.permute.xlu1 %v1924_v30 }
 0x58d   : > { %1075 = vperm.xlu1 %1775, %v700_v28  }
 0x5b1   : > { %1229 = vmax.xlane.f32.xlu1 %v1228_v31 }
 0x5fb   : > { %v1043_v32 = vpop.f32.mrf.mxu0 }
 0x5fd   : > { %v1689_v33 = vpop.f32.mrf.mxu0 }
 0x5fe   : > { %v1056_v8 = vpop.permute.xlu1 %1055  ;;  %v1050_v48 = vpop.permute.xlu0 %1049 }
 0x5ff   : > { %v1058_v34 = vmul.f32 %v1056_v8, %v1043_v32  ;;  %v1052_v51 = vmul.f32 %v1050_v48, %v1043_v32 }
 0x601   : > { %1060 = vrot.lane.b32.xlu1 %v1058_v34, %s1918_s19  ;;  %s1926_s19 = smov [#allocation4]  }
 0x602   : > { %s1428_s30 = sshll.u32 %s1926_s19, 4  ;;  %s1429_s30 = int_to_ptr.vmem [resolvable:$true] %s1428_s30 }
 0x603   : > { %v1066_v35 = vpop.permute.xlu1 %1065  ;;  %s1796_s13 = scalar_lea.vmem %s1429_s30, 256  ;;  %p1803_p1 = scmp.lt.s32.totalorder %s1429_s30, %s1429_s30 }
 0x604   : > { %v1068_v36 = vmul.f32 %v1066_v35, %v1043_v32  ;;  %p1797_p12 = scmp.ne.s32.totalorder %s1429_s30, %s1796_s13  ;;  %p1804_p3 = scmp.lt.s32.totalorder %s1796_s13, %s1796_s13 }
 0x606   : > { %1070 = vrot.lane.b32.xlu0 %v1068_v36, %s1920_s14  ;;  %p1798_p13 = pnand %p1797_p12, %p2306_p2  ;;  %p1805_p4 = por %p1804_p3, %p1803_p1 }
 0x608   : > { %v1076_v38 = vpop.permute.xlu1 %1075  ;;  %p1799_p0 = pneg %p1798_p13 }
 0x609   : > { %v1078_v40 = vmul.f32 %v1076_v38, %v1043_v32 }
 0x60a   : > { %1097 = vbcast.lane.b32.xlu0 %v1095_v39, 256  ;;  %p1806_p7 = pnand %p1805_p4, %p1799_p0 }
 0x60b   : > { %1080 = vrot.lane.b32.xlu1 %v1078_v40, %s1925_s25 }
 0x60f   : > { %1090 = vbcast.lane.b32.xlu1 %v1088_v42, 256 }
 0x63a   : > { %v1230_v43 = vpop.xlane.xlu1 %1229 }
 0x63b   : > { %v1231_v44 = vsub.f32 %v1224_v24, %v1230_v43 }
 0x63d   : > { %v1232_v45 = vmul.f32 1.442695, %v1231_v44 }
 0x63f   : > { %1788 = vpow2.f32 %v1232_v45 }
 0x64c   : > { %v1789_v46 = vpop.eup %1788 }
 0x64d   : > { %v1234_v47 = vsel %vm789_vm10, %v1789_v46, 0.0 }
 0x64e   : > { %1235 = vadd.xlane.f32.xlu0 %v1234_v47 }
 0x673   : > { %v1061_v49 = vpop.permute.xlu1 %1060 }
 0x674   : > { %v1063_v55 = vadd.f32 %v1061_v49, %v1052_v51 }
 0x678   : > { %v1071_v52 = vpop.permute.xlu0 %1070 }
 0x679   : > { %v1073_v56 = vadd.f32 %v1071_v52, %v1063_v55 }
 0x67c   : > { %v1098_v4 = vpop.permute.xlu0 %1097 }
 0x67d   : > { %v1081_v57 = vpop.permute.xlu1 %1080 }
 0x67e   : > { %v1083_v58 = vadd.f32 %v1081_v57, %v1073_v56 }
 0x680   : > { %v1084_v59 = vmax.f32 %v1083_v58, 0.0 }
 0x681   : > { %v1091_v1 = vpop.permute.xlu1 %1090 }
 0x682   : > { %v1106_v50 = vrot.slane %v1084_v59, %v2172_v0 }
 0x684   : > { %v1107_v60 = vcombine.high %v1106_v50, %v1106_v50  ;;  %v1114_v61 = vrot.slane %v1106_v50, %v2172_v0 }
 0x686   : > { %v1121_v62 = vrot.slane %v1107_v60, %v2172_v0  ;;  %v1125_v63 = vrot.slane %v1114_v61, %v1087_v41 }
 0x688   : > { %v1132_v2 = vmul.f32 %v1125_v63, %v1091_v1  ;;  %v1129_v3 = vrot.slane %v1121_v62, %v1087_v41 }
 0x68a   : > { %v1134_v5 = vadd.f32 %v1132_v2, %v2160_v53  ;;  %v1133_v6 = vmul.f32 %v1129_v3, %v1098_v4 }
 0x68c   : > { %v1136_v7 = vmul.f32 %v1134_v5, %v1134_v5  ;;  %v1135_v9 = vadd.f32 %v1133_v6, %v2164_v54 }
 0x68e   : > { %v1138_v10 = vsel %vm706_vm9, %v1136_v7, 0.0  ;;  %v1137_v11 = vmul.f32 %v1135_v9, %v1135_v9 }
 0x68f   : > { %1139 = vadd.xlane.f32.xlu0 %v1138_v10 }
 0x690   : > { %v1141_v12 = vsel %vm706_vm9, %v1137_v11, 0.0 }
 0x691   : > { %1142 = vadd.xlane.f32.xlu1 %v1141_v12 }
 0x6d7   : > { %v1236_v13 = vpop.xlane.xlu0 %1235 }
 0x6d8   : > { %1790 = vrcp.f32 %v1236_v13 }
 0x6e5   : > { %v1791_v18 = vpop.eup %1790 }
 0x6e6   : > { %v1238_v53 = vmul.f32 %v1791_v18, %v1789_v46 }
 0x6e8   : > { %v1246_v19 = vrot.slane %v1238_v53, %v2172_v0 }
 0x6ea   : > { %v1247_v20 = vcombine.high %v1246_v19, %v1246_v19  ;;  %v1254_v23 = vrot.slane %v1246_v19, %v2172_v0 }
 0x6ec   : > { %v1261_v25 = vrot.slane %v1247_v20, %v2172_v0 }
 0x718   : > { %v1140_v14 = vpop.xlane.xlu0 %1139 }
 0x719   : > { %v1144_v15 = vadd.f32 1e-08, %v1140_v14 }
 0x71a   : > { %v1143_v16 = vpop.xlane.xlu1 %1142 }
 0x71b   : > { %1792 = vrsqrt.f32 %v1144_v15  ;;  %v1145_v17 = vadd.f32 1e-08, %v1143_v16 }
 0x71d   : > { %1794 = vrsqrt.f32 %v1145_v17 }
 0x728   : > { %v1793_v54 = vpop.eup %1792 }
 0x729   : > { %v1148_v21 = vmul.f32 %v1793_v54, %v1134_v5 }
 0x72a   : > { %v1795_v22 = vpop.eup %1794 }
 0x72b   : > { %1696 = vmatpush3.msra.mxu1 %v1148_v21  ;;  %1406 = vst.msk [vmem:[#allocation4] sm:$0xff] %vm706_vm9, %v1148_v21  ;;  %v1149_v24 = vmul.f32 %v1795_v22, %v1135_v9 }
 0x72c   : > { %1698 = vmatmul.mubr.msk.f32.vlgmr.msra.gmra.mxu1 %vm821_vm12, %v1254_v23 }
 0x72d   : > { %1701 = vmatpush3.msra.mxu0 %v1149_v24  ;;  %1407 = vst.msk [vmem:[#allocation4 + $0x8] sm:$0xff] %vm706_vm9, %v1149_v24 }
 0x72e   : > { %1703 = vmatmul.mubr.msk.f32.vlgmr.msra.gmra.mxu0 %vm821_vm12, %v1261_v25 }
 0x72f   : > { %1809 = shalt.err (!%p1806_p7)
}
 0x730   : > { %s1927_s14 = smov 128   ;;  %s1928_s18 = smov 8  }
 0x731   : > { %1706 = dma.vmem_to_hbm [thread:$0]  (%p2306_p2), %s1429_s30, 256, %s2302_s9, [#allocation5], %s1927_s14, %s1927_s14, %s1928_s18  }
 0x732   : > { %s1417_s16 = sand.u32 1, %s2013_s8   ;;  %s1577_s27 = sshll.u32 %s2013_s8, 5 }
 0x733   : > { %s1453_s19 = scalar_lea.hbm %s2304_s11, %s1577_s27  ;;  %s1455_s13 = sshll.u32 %s387_s23, 4  ;;  %s1456_s13 = int_to_ptr.vmem [resolvable:$true] %s1455_s13 }
 0x734   : > { %s1418_s0 = scalar_lea.sflag [#allocation5], %s1417_s16  ;;  %s1820_s1 = scalar_lea.vmem %s1456_s13, 32 }
 0x735   : > { %p1821_p8 = scmp.ne.s32.totalorder %s1456_s13, %s1820_s1  ;;  %s1929_s2 = smov [#allocation8]  }
 0x736   : > { %s1824_s3 = sshll.u32 %s1929_s2, 4  ;;  %s1825_s3 = int_to_ptr.vmem [resolvable:$false] %s1824_s3 }
 0x737   : > { %p1822_p9 = pnand %p1821_p8, %p2033_p5  ;;  %s1826_s26 = scalar_lea.vmem %s1825_s3, 64 }
 0x738   : > { %p1827_p11 = scmp.lt.s32.totalorder %s1456_s13, %s1825_s3  ;;  %p1828_p12 = scmp.lt.s32.totalorder %s1826_s26, %s1820_s1 }
 0x739   : > { %p1823_p10 = pneg %p1822_p9 }
 0x73a   : > { %p1829_p13 = por %p1828_p12, %p1827_p11 }
 0x73c   : > { %p1830_p0 = pnand %p1829_p13, %p1823_p10 }
 0x73e   : > { %1833 = shalt.err (!%p1830_p0)
}
 0x73f   : > { %s1834_s30 = scalar_lea.hbm %s1453_s19, 32  ;;  %s1838_s14 = scalar_lea.hbm %s2304_s11, 96 }
 0x740   : > { %p1835_p1 = scmp.ne.s32.totalorder %s1453_s19, %s1834_s30  ;;  %p1839_p7 = scmp.lt.s32.totalorder %s1453_s19, %s2304_s11 }
 0x741   : > { %p1840_p8 = scmp.lt.s32.totalorder %s1838_s14, %s1834_s30 }
 0x742   : > { %p1836_p3 = pnand %p1835_p1, %p2033_p5 }
 0x743   : > { %p1841_p9 = por %p1840_p8, %p1839_p7 }
 0x744   : > { %p1837_p4 = pneg %p1836_p3 }
 0x746   : > { %p1842_p2 = pnand %p1841_p9, %p1837_p4 }
 0x748   : > { %1845 = shalt.err (!%p1842_p2)
}
 0x749   : > { %1709 = dma.vmem_to_hbm [thread:$0]  (%p2033_p5), %s1456_s13, 32, %s1453_s19, %s1418_s0   ;;  %vm1413_vm15 = vcmask 254976  }
 0x74a   : > { %s1930_s1 = smov [#allocation6]   ;;  %p2318_p11 = scmp.eq.s32.totalorder %s2013_s8, 2 }
 0x74b   : > { %s1442_s2 = sshll.u32 %s1930_s1, 4  ;;  %s1443_s2 = int_to_ptr.vmem [resolvable:$true] %s1442_s2 }
 0x74c   : > { %s1846_s3 = scalar_lea.vmem %s1443_s2, 32  ;;  %p1853_p13 = scmp.lt.s32.totalorder %s1443_s2, %s1443_s2 }
 0x74d   : > { %p1847_p10 = scmp.ne.s32.totalorder %s1443_s2, %s1846_s3  ;;  %p1854_p0 = scmp.lt.s32.totalorder %s1846_s3, %s1846_s3 }
 0x74f   : > { %p1848_p2 = pnand %p1847_p10, %p2318_p11  ;;  %p1855_p5 = por %p1854_p0, %p1853_p13 }
 0x751   : > { %p1849_p12 = pneg %p1848_p2 }
 0x753   : > { %p1856_p1 = pnand %p1855_p5, %p1849_p12 }
 0x7ec   : > { %v1330_v0 = vpop.f32.mrf.mxu1 }
 0x7ee   : > { %v1699_v26 = vpop.f32.mrf.mxu1  ;;  %v1402_v27 = vpop.f32.mrf.mxu0 }
 0x7ef   : > { %v1410_v28 = vrot.slane %v1402_v27, 7 }
 0x7f0   : > { %v1704_v29 = vpop.f32.mrf.mxu0 }
 0x7f1   : > { %v1411_v30 = vsel %vm973_vm14, %v1410_v28, %v1330_v0 }
 0x7f2   : > { %1414 = vst.msk [vmem:[#allocation6] sm:$0x3] %vm1413_vm15, %v1411_v30 }
 0x7f3   : > { %1859 = shalt.err (!%p1856_p1)
}
 0x7f4   : > { %p2319_p3 = pmov %p2318_p11 }
 0x7f6   : > { %1708 = dma.vmem_to_hbm [thread:$0]  (%p2319_p3), %s1443_s2, 32, %s2303_s10, [#allocation7]  }
 0x7f7   : > { %p2320_p4 = pmov %p2319_p3 }
 0x7f8   : > { %p2321_p7 = pmov %p2319_p3 }
 0x7f9   : > { %1887 = dma.done.wait (%p2320_p4), [#allocation5], 256  }
 0x7fa   : > { %1889 = vsyncadd (%p2321_p7), [#allocation5], 4294967040  ;;  %p2322_p8 = pmov %p2319_p3 }
 0x7fb   : > { %p2323_p9 = pmov %p2319_p3 }
 0x7fc   : > { %1891 = dma.done.wait (%p2322_p8), [#allocation7], 32  }
 0x7fd   : > { %1893 = vsyncadd (%p2323_p9), [#allocation7], 4294967264 }
 0x7fe PF: > { %p1723_p10 = scmp.ge.s32.totalorder %s1912_s22, 2  ;;  %s2324_s16 = sadd.s32 4294967294, %s1912_s22  }
 0x7ff   : > { %s1475_s27 = sand.u32 1, %s2324_s16  }
 0x800   : > { %p1716_p11 = pnand %p1723_p10, %p2037_p6  ;;  %s1476_s17 = scalar_lea.sflag [#allocation5], %s1475_s27 }
 0x802   : > { %p1717_p2 = pneg %p1716_p11 }
 0x804   : > { %1895 = dma.done.wait (%p1717_p2), %s1476_s17, 32  }
 0x805   : > { %1897 = vsyncadd (%p1717_p2), %s1476_s17, 4294967264  ;;  %s2325_s25 = sld [smem:[#allocation12_spill]]  ;;  %p22_p12 = scmp.ge.s32.totalorder %s2017_s24, 5  }
 0x806   : > { %s2326_s19 = smov %s1904_s20  ;;  %s2327_s20 = smov %s1908_s21 }
 0x807   : > { %s2329_s22 = smov %s2017_s24  ;;  %24 = sbr.rel (!%p22_p12) target bundleno = 9 (0x9), region = 113 }
 0x80b   : > { %s2328_s21 = smov %s2325_s25 }
 0x80c   :  { %1481 = vsyncpa [#allocation5], 1 }
 0x80d   :  { %1483 = vsyncpa [#allocation5 + $0x1], 1 }
 0x80e   :  { %1484 = vsyncpa [#allocation7], 1 }

</bundles_post_ra>
